<compile_context>
chip_gen: v6e
topology: v6e:2x2x1
jax: 0.10.0
libtpu: 0.0.40
codegen_flags: <defaults>
</compile_context>

<pallas_src>
import functools
import math

import jax
import jax.numpy as jnp
from jax.experimental import pallas as pl
from jax.experimental.pallas import tpu as pltpu


def _round_up(x, m):
    return ((x + m - 1) // m) * m


# ----------------------------------------------------------------------------
# Kernels
# ----------------------------------------------------------------------------
def _gcn_fused_bias_kernel(adj_ref, x_ref, w_ref, b_ref, o_ref):
    # out = adj @ (x @ W) + b, everything resident in VMEM, single invocation.
    xw = jnp.dot(x_ref[...], w_ref[...], preferred_element_type=jnp.float32)
    y = jnp.dot(adj_ref[...], xw, preferred_element_type=jnp.float32) + b_ref[...]
    o_ref[...] = y.astype(o_ref.dtype)


def _gcn_fused_nobias_kernel(adj_ref, x_ref, w_ref, o_ref):
    xw = jnp.dot(x_ref[...], w_ref[...], preferred_element_type=jnp.float32)
    y = jnp.dot(adj_ref[...], xw, preferred_element_type=jnp.float32)
    o_ref[...] = y.astype(o_ref.dtype)


def _xw_kernel(x_ref, w_ref, o_ref):
    # One-shot feature @ weight (row-tiled).  OOB rows of a ragged last block
    # produce garbage that is discarded on the masked write-back.
    o_ref[...] = jnp.dot(
        x_ref[...], w_ref[...], preferred_element_type=jnp.float32
    ).astype(o_ref.dtype)


def _gcn_tiled_kernel(*refs, has_bias, use_scratch, n_nodes, block_k):
    # grid = (row-blocks of adj [parallel], contraction-blocks over nodes
    # [arbitrary]).  XW is precomputed; this kernel only does adj @ xw.
    if use_scratch:
        if has_bias:
            adj_ref, xw_ref, b_ref, o_ref, acc_ref = refs
        else:
            adj_ref, xw_ref, o_ref, acc_ref = refs
            b_ref = None
    else:
        if has_bias:
            adj_ref, xw_ref, b_ref, o_ref = refs
        else:
            adj_ref, xw_ref, o_ref = refs
            b_ref = None
        acc_ref = o_ref  # f32 output: accumulate directly into the resident block

    k = pl.program_id(1)
    nk = pl.num_programs(1)

    @pl.when(k == 0)
    def _():
        acc_ref[...] = jnp.zeros_like(acc_ref)

    adj_tile = adj_ref[...]
    xw_tile = xw_ref[...]
    if n_nodes % block_k != 0:
        # Ragged last contraction block: zero the out-of-range adj columns and
        # xw rows so OOB garbage (possibly non-finite) never pollutes the sum.
        col = jax.lax.broadcasted_iota(jnp.int32, adj_tile.shape, 1) + k * block_k
        adj_tile = jnp.where(col < n_nodes, adj_tile, jnp.zeros_like(adj_tile))
        row = jax.lax.broadcasted_iota(jnp.int32, xw_tile.shape, 0) + k * block_k
        xw_tile = jnp.where(row < n_nodes, xw_tile, jnp.zeros_like(xw_tile))

    acc_ref[...] += jnp.dot(adj_tile, xw_tile, preferred_element_type=jnp.float32)

    if has_bias or use_scratch:
        @pl.when(k == nk - 1)
        def _():
            y = acc_ref[...]
            if b_ref is not None:
                y = y + b_ref[...]
            o_ref[...] = y.astype(o_ref.dtype)


# ----------------------------------------------------------------------------
# Wrappers
# ----------------------------------------------------------------------------
_VMEM_LIMIT = 48 * 1024 * 1024  # safe on v7x (64 MiB phys), generous on v5e/v6e


def _vmem_spec():
    return pl.BlockSpec(memory_space=pltpu.MemorySpace.VMEM)


def _gcn_fused(adj, feature, weight, bias, out_dtype):
    n = adj.shape[0]
    kdim = weight.shape[1]
    out_shape = jax.ShapeDtypeStruct((n, kdim), out_dtype)
    params = pltpu.CompilerParams(vmem_limit_bytes=_VMEM_LIMIT)
    if bias is not None:
        return pl.pallas_call(
            _gcn_fused_bias_kernel,
            in_specs=[_vmem_spec(), _vmem_spec(), _vmem_spec(), _vmem_spec()],
            out_specs=_vmem_spec(),
            out_shape=out_shape,
            compiler_params=params,
        )(adj, feature, weight, bias.reshape(1, kdim))
    return pl.pallas_call(
        _gcn_fused_nobias_kernel,
        in_specs=[_vmem_spec(), _vmem_spec(), _vmem_spec()],
        out_specs=_vmem_spec(),
        out_shape=out_shape,
        compiler_params=params,
    )(adj, feature, weight)


def _compute_xw(feature, weight, block_m, out_dtype):
    """feature @ weight, computed once (row-tiled)."""
    n, fdim = feature.shape
    kdim = weight.shape[1]
    bm = n if n <= block_m else _round_up(block_m, 8)
    grid = (pl.cdiv(n, bm),)
    return pl.pallas_call(
        _xw_kernel,
        grid=grid,
        in_specs=[pl.BlockSpec((bm, fdim), lambda i: (i, 0)),
                  pl.BlockSpec((fdim, kdim), lambda i: (0, 0))],
        out_specs=pl.BlockSpec((bm, kdim), lambda i: (i, 0)),
        out_shape=jax.ShapeDtypeStruct((n, kdim), out_dtype),
        compiler_params=pltpu.CompilerParams(
            dimension_semantics=("parallel",),
            vmem_limit_bytes=_VMEM_LIMIT),
    )(feature, weight)


def _gcn_tiled(adj, xw, bias, *, block_m, block_k, out_dtype):
    n = adj.shape[0]
    kdim = xw.shape[1]

    # Row (parallel) tile: keep >=2 blocks once the graph is big enough so
    # v7x's two TensorCores can split the row axis; a single full-extent block
    # is fine for small graphs.
    row_target = block_m
    if n > 256:
        row_target = min(block_m, _round_up(pl.cdiv(n, 2), 128))
    bm = n if n <= row_target else _round_up(row_target, 8)
    # Contraction tile: full extent if it fits, otherwise a 128-aligned tile
    # with the ragged tail masked inside the kernel (no jnp.pad copy of adj).
    bk = n if n <= block_k else _round_up(block_k, 128)

    grid = (pl.cdiv(n, bm), pl.cdiv(n, bk))
    use_scratch = jnp.dtype(out_dtype) != jnp.dtype(jnp.float32)

    in_specs = [
        pl.BlockSpec((bm, bk), lambda i, k: (i, k)),       # adj tile
        pl.BlockSpec((bk, kdim), lambda i, k: (k, 0)),     # precomputed XW rows
    ]
    args = [adj, xw]
    if bias is not None:
        in_specs.append(pl.BlockSpec((1, kdim), lambda i, k: (0, 0)))
        args.append(bias.reshape(1, kdim))

    scratch = [pltpu.VMEM((bm, kdim), jnp.float32)] if use_scratch else []

    return pl.pallas_call(
        functools.partial(_gcn_tiled_kernel, has_bias=bias is not None,
                          use_scratch=use_scratch, n_nodes=n, block_k=bk),
        grid=grid,
        in_specs=in_specs,
        out_specs=pl.BlockSpec((bm, kdim), lambda i, k: (i, 0)),
        out_shape=jax.ShapeDtypeStruct((n, kdim), out_dtype),
        scratch_shapes=scratch,
        compiler_params=pltpu.CompilerParams(
            dimension_semantics=("parallel", "arbitrary"),
            vmem_limit_bytes=_VMEM_LIMIT),
    )(*args)


def graph_convolution(adj, feature, weight, bias=None, *, force_tiled=False,
                      block_m=512, block_k=512, matmul_dtype=None,
                      fused_vmem_budget_bytes=8 * 1024 * 1024):
    """GraphConvolutionLayer.forward: adj @ (feature @ weight) [+ bias].

    matmul_dtype: optionally cast adj and the precomputed XW (e.g. bfloat16)
    for the big memory-bound matmul; accumulation and bias add stay f32.
    """
    n, fdim = feature.shape
    kdim = weight.shape[1]
    out_dtype = feature.dtype

    # Whole-array f32 VMEM residency estimate for the no-grid fused path,
    # INCLUDING the feature@weight intermediate the compiler must materialize.
    fused_bytes = 4 * (n * n + n * fdim + fdim * kdim + 2 * n * kdim + kdim)
    if not force_tiled and fused_bytes <= fused_vmem_budget_bytes:
        # Tiny graphs: per-grid-step overhead would dominate; one un-pipelined
        # whole-in-VMEM invocation is cheapest.
        return _gcn_fused(adj, feature, weight, bias, out_dtype)

    xw = _compute_xw(feature, weight, block_m,
                     out_dtype=(matmul_dtype or out_dtype))
    if matmul_dtype is not None:
        adj = adj.astype(matmul_dtype)
    return _gcn_tiled(adj, xw, bias, block_m=block_m, block_k=block_k,
                      out_dtype=out_dtype)


# ----------------------------------------------------------------------------
if __name__ == "__main__":
    key = jax.random.PRNGKey(0)
    k_adj, k_feat, k_w, k_b, k_adj2, k_feat2 = jax.random.split(key, 6)

    feature_size = 128
    kernel_size = 128

    # PyTorch init: uniform(-1/sqrt(kernel_size), 1/sqrt(kernel_size))
    stdv = 1.0 / math.sqrt(kernel_size)
    weight = jax.random.uniform(k_w, (feature_size, kernel_size),
                                jnp.float32, -stdv, stdv)
    bias = jax.random.uniform(k_b, (kernel_size,), jnp.float32, -stdv, stdv)

    def make_graph(ka, kf, n):
        a = jax.random.uniform(ka, (n, n), jnp.float32)
        a = a / jnp.sum(a, axis=1, keepdims=True)   # dense stand-in for sparse adj
        f = jax.random.normal(kf, (n, feature_size), jnp.float32)
        return a, f

    # --- small graph: fused path, forced tiled, ragged tiling, no-bias ------
    N1 = 200
    adj1, feat1 = make_graph(k_adj, k_feat, N1)
    ref1 = adj1 @ (feat1 @ weight) + bias

    out_fused = jax.block_until_ready(graph_convolution(adj1, feat1, weight, bias))
    out_tiled_small = jax.block_until_ready(
        graph_convolution(adj1, feat1, weight, bias, force_tiled=True))
    out_ragged = jax.block_until_ready(
        graph_convolution(adj1, feat1, weight, bias, force_tiled=True,
                          block_m=128, block_k=128))  # exercises in-kernel tail masking
    out_nobias = jax.block_until_ready(graph_convolution(adj1, feat1, weight, None))

    assert out_fused.shape == (N1, kernel_size)
    assert jnp.all(jnp.isfinite(out_fused))
    assert jnp.allclose(out_fused, ref1, rtol=1e-4, atol=1e-4)
    assert jnp.allclose(out_tiled_small, ref1, rtol=1e-4, atol=1e-4)
    assert jnp.allclose(out_ragged, ref1, rtol=1e-4, atol=1e-4)
    assert jnp.allclose(out_nobias, ref1 - bias, rtol=1e-4, atol=1e-4)

    # --- mid-size graph: multi-block parallel row axis + ragged last blocks
    #     on both grid axes with the default 512-class tiles; bf16 option -----
    N2 = 640
    adj2, feat2 = make_graph(k_adj2, k_feat2, N2)
    ref2 = adj2 @ (feat2 @ weight) + bias

    out_tiled = jax.block_until_ready(
        graph_convolution(adj2, feat2, weight, bias, force_tiled=True))
    out_bf16 = jax.block_until_ready(
        graph_convolution(adj2, feat2, weight, bias, force_tiled=True,
                          matmul_dtype=jnp.bfloat16))

    assert out_tiled.shape == (N2, kernel_size)
    assert jnp.all(jnp.isfinite(out_tiled))
    assert jnp.allclose(out_tiled, ref2, rtol=1e-4, atol=1e-4)
    assert jnp.allclose(out_bf16, ref2, rtol=3e-2, atol=3e-2)

    print("KERNEL_OK")
</pallas_src>

<mosaic_0001>
module attributes {stable_mosaic.version = 11 : i64} {
  func.func @_gcn_fused_bias_kernel(%arg0: memref<200x200xf32, #tpu.memory_space<vmem>>, %arg1: memref<200x128xf32, #tpu.memory_space<vmem>>, %arg2: memref<128x128xf32, #tpu.memory_space<vmem>>, %arg3: memref<1x128xf32, #tpu.memory_space<vmem>>, %arg4: memref<200x128xf32, #tpu.memory_space<vmem>>) attributes {dimension_semantics = [], scalar_prefetch = 0 : i64, scratch_operands = 0 : i64, tpu.core_type = #tpu.core_type<tc>} {
    %c0 = arith.constant 0 : index
    %c0_0 = arith.constant 0 : index
    %0 = vector.load %arg1[%c0, %c0_0] : memref<200x128xf32, #tpu.memory_space<vmem>>, vector<200x128xf32>
    %c0_1 = arith.constant 0 : index
    %c0_2 = arith.constant 0 : index
    %1 = vector.load %arg2[%c0_1, %c0_2] : memref<128x128xf32, #tpu.memory_space<vmem>>, vector<128x128xf32>
    %cst = arith.constant dense<0.000000e+00> : vector<200x128xf32>
    %2 = tpu.matmul %0, %1, %cst {dimension_numbers = #tpu.dot_dimension_numbers<[1], [0], [0], [1], [0, 0, 1, 1], [], []>} : vector<200x128xf32>, vector<128x128xf32>, vector<200x128xf32> -> vector<200x128xf32>
    %c0_3 = arith.constant 0 : index
    %c0_4 = arith.constant 0 : index
    %3 = vector.load %arg0[%c0_3, %c0_4] : memref<200x200xf32, #tpu.memory_space<vmem>>, vector<200x200xf32>
    %cst_5 = arith.constant dense<0.000000e+00> : vector<200x128xf32>
    %4 = tpu.matmul %3, %2, %cst_5 {dimension_numbers = #tpu.dot_dimension_numbers<[1], [0], [0], [1], [0, 0, 1, 1], [], []>} : vector<200x200xf32>, vector<200x128xf32>, vector<200x128xf32> -> vector<200x128xf32>
    %c0_6 = arith.constant 0 : index
    %c0_7 = arith.constant 0 : index
    %5 = vector.load %arg3[%c0_6, %c0_7] : memref<1x128xf32, #tpu.memory_space<vmem>>, vector<1x128xf32>
    %6 = vector.broadcast %5 : vector<1x128xf32> to vector<200x128xf32>
    %7 = arith.addf %4, %6 : vector<200x128xf32>
    %c0_8 = arith.constant 0 : index
    %c0_9 = arith.constant 0 : index
    %8 = vector.load %arg4[%c0_8, %c0_9] : memref<200x128xf32, #tpu.memory_space<vmem>>, vector<200x128xf32>
    tpu.vector_store %arg4[%c0_8, %c0_9], %7 {strides = array<i32>} : memref<200x128xf32, #tpu.memory_space<vmem>>, vector<200x128xf32>,
    return
  }
}

</mosaic_0001>

<bundles_post_ra>
// kernel: tpu_custom_call.1
= control target key start
LH: loop header
LB: loop body
LE: loop exit
PB: predicated region body
PF: predicated region fallthrough
CT: control target
= control target key end

     0   :  { %9 = vsyncpa [#allocation3], 0  ;;  %s1247_s0 = inlined_call_operand.hbm [shape: f32[200,200], index: 0, kind: input, shape index: {}]   ;;  %s1248_s1 = inlined_call_operand.hbm [shape: f32[200,128], index: 1, kind: input, shape index: {}]   ;;  %s1249_s2 = inlined_call_operand.hbm [shape: f32[128,128], index: 2, kind: input, shape index: {}]   ;;  %s1250_s3 = inlined_call_operand.vmem [shape: f32[1,128], index: 3, kind: input, shape index: {}]   ;;  %s1251_s4 = inlined_call_operand.hbm [shape: f32[200,128], index: 4, kind: output, shape index: {}]  }
   0x1   :  { %10 = vsyncpa [#allocation6], 0 }
   0x2   :  { %11 = vsyncpa [#allocation4], 0  ;;  %s976_s15 = smov [#allocation5]  }
   0x3   :  { %s29_s16 = sshll.u32 %s976_s15, 4  ;;  %s30_s16 = int_to_ptr.vmem [resolvable:$true] %s29_s16 }
   0x4   :  { %s898_s17 = scalar_lea.vmem %s30_s16, 3200  ;;  %p903_p1 = scmp.lt.s32.totalorder %s30_s16, %s30_s16 }
   0x5   :  { %p899_p0 = scmp.ne.s32.totalorder %s30_s16, %s898_s17  ;;  %p904_p2 = scmp.lt.s32.totalorder %s898_s17, %s898_s17 }
   0x7   :  { %p905_p3 = por %p904_p2, %p903_p1 }
   0x9   :  { %p906_p4 = pnand %p905_p3, %p899_p0 }
   0xb   :  { %909 = shalt.err (!%p906_p4)
}
   0xc   :  { %s977_s18 = smov 128   ;;  %s978_s19 = smov 8  }
   0xd   :  { %35 = dma.hbm_to_vmem [thread:$0]  %s1248_s1, 3200, %s30_s16, [#allocation6], %s977_s18, %s977_s18, %s978_s19  }
   0xe   :  { %s979_s22 = smov [#allocation2]  }
   0xf   :  { %s17_s23 = sshll.u32 %s979_s22, 4  ;;  %s18_s23 = int_to_ptr.vmem [resolvable:$true] %s17_s23 }
  0x10   :  { %s918_s24 = scalar_lea.vmem %s18_s23, 6400  ;;  %p923_p6 = scmp.lt.s32.totalorder %s18_s23, %s18_s23 }
  0x11   :  { %p919_p5 = scmp.ne.s32.totalorder %s18_s23, %s918_s24  ;;  %p924_p7 = scmp.lt.s32.totalorder %s918_s24, %s918_s24 }
  0x13   :  { %p925_p8 = por %p924_p7, %p923_p6 }
  0x15   :  { %p926_p9 = pnand %p925_p8, %p919_p5 }
  0x17   :  { %929 = shalt.err (!%p926_p9)
}
  0x18   :  { %s980_s25 = smov 256   ;;  %s981_s26 = smov 16  }
  0x19   :  { %23 = dma.hbm_to_vmem [thread:$0]  %s1247_s0, 6400, %s18_s23, [#allocation3], %s980_s25, %s980_s25, %s981_s26  }
  0x1a   :  { %s982_s29 = smov [#allocation7]  }
  0x1b   :  { %s41_s30 = sshll.u32 %s982_s29, 4  ;;  %s42_s30 = int_to_ptr.vmem [resolvable:$true] %s41_s30 }
  0x1c   :  { %s938_s1 = scalar_lea.vmem %s42_s30, 2048  ;;  %p943_p11 = scmp.lt.s32.totalorder %s42_s30, %s42_s30 }
  0x1d   :  { %p939_p10 = scmp.ne.s32.totalorder %s42_s30, %s938_s1  ;;  %p944_p12 = scmp.lt.s32.totalorder %s938_s1, %s938_s1 }
  0x1f   :  { %p945_p13 = por %p944_p12, %p943_p11 }
  0x21   :  { %p946_p0 = pnand %p945_p13, %p939_p10 }
  0x23   :  { %949 = shalt.err (!%p946_p0)
}
  0x24   :  { %47 = dma.hbm_to_vmem [thread:$0]  %s1249_s2, 2048, %s42_s30, [#allocation6], %s977_s18, %s977_s18, %s978_s19  }
  0x25   :  { %970 = dma.done.wait [#allocation3], 6400  }
  0x26   :  { %971 = vsyncadd [#allocation3], 4294960896 }
  0x27   :  { %972 = dma.done.wait [#allocation6], 5248  }
  0x28   :  { %973 = vsyncadd [#allocation6], 4294962048  ;;  %v983_v0 = vmov 0.0   ;;  %vm984_vm0 = vmmov 0   ;;  %v99_v1 = vld [vmem:[#allocation7 + $0x78] sm:$0xff]  ;;  %v98_v2 = vld [vmem:[#allocation7 + $0x70] sm:$0xff] }
  0x29   :  { %723 = vmatprep.subr.mxu0 %v983_v0  ;;  %755 = vmatprep.mubr.msk.f32.mxu0 %vm984_vm0, %v983_v0  ;;  %v97_v3 = vld [vmem:[#allocation7 + $0x68] sm:$0xff]  ;;  %v96_v4 = vld [vmem:[#allocation7 + $0x60] sm:$0xff]  ;;  %v95_v5 = vld [vmem:[#allocation7 + $0x58] sm:$0xff]  ;;  %vm347_vm1 = vcmask 588800  }
  0x2a   :  { %830 = vmatprep.subr.mxu1 %v983_v0  ;;  %724 = vmatpush3.msra.mxu0 %v99_v1  ;;  %v94_v6 = vld [vmem:[#allocation7 + $0x50] sm:$0xff]  ;;  %v93_v7 = vld [vmem:[#allocation7 + $0x48] sm:$0xff]  ;;  %v92_v8 = vld [vmem:[#allocation7 + $0x40] sm:$0xff] }
  0x2b   :  { %725 = vmatprep.subr.mxu0 %v983_v0  ;;  %v91_v9 = vld [vmem:[#allocation7 + $0x38] sm:$0xff]  ;;  %v90_v10 = vld [vmem:[#allocation7 + $0x30] sm:$0xff]  ;;  %v89_v11 = vld [vmem:[#allocation7 + $0x28] sm:$0xff] }
  0x2c   :  { %726 = vmatpush3.msra.mxu0 %v98_v2  ;;  %v88_v12 = vld [vmem:[#allocation7 + $0x20] sm:$0xff]  ;;  %v87_v13 = vld [vmem:[#allocation7 + $0x18] sm:$0xff]  ;;  %v86_v14 = vld [vmem:[#allocation7 + $0x10] sm:$0xff] }
  0x2d   :  { %727 = vmatprep.subr.mxu0 %v983_v0  ;;  %v85_v15 = vld [vmem:[#allocation7 + $0x8] sm:$0xff]  ;;  %v84_v16 = vld [vmem:[#allocation7] sm:$0xff]  ;;  %v59_v17 = vld [vmem:[#allocation5] sm:$0xff] }
  0x2e   :  { %728 = vmatpush3.msra.mxu0 %v97_v3  ;;  %v60_v18 = vld [vmem:[#allocation5 + $0x8] sm:$0xff]  ;;  %v61_v19 = vld [vmem:[#allocation5 + $0x10] sm:$0xff]  ;;  %v62_v20 = vld [vmem:[#allocation5 + $0x18] sm:$0xff] }
  0x2f   :  { %729 = vmatprep.subr.mxu0 %v983_v0  ;;  %v63_v21 = vld [vmem:[#allocation5 + $0x20] sm:$0xff]  ;;  %v64_v22 = vld [vmem:[#allocation5 + $0x28] sm:$0xff]  ;;  %v65_v23 = vld [vmem:[#allocation5 + $0x30] sm:$0xff] }
  0x30   :  { %730 = vmatpush3.msra.mxu0 %v96_v4  ;;  %v66_v24 = vld [vmem:[#allocation5 + $0x38] sm:$0xff]  ;;  %v67_v25 = vld [vmem:[#allocation5 + $0x40] sm:$0xff]  ;;  %v68_v26 = vld [vmem:[#allocation5 + $0x48] sm:$0xff] }
  0x31   :  { %731 = vmatprep.subr.mxu0 %v983_v0  ;;  %v69_v27 = vld [vmem:[#allocation5 + $0x50] sm:$0xff]  ;;  %v70_v28 = vld [vmem:[#allocation5 + $0x58] sm:$0xff]  ;;  %v71_v29 = vld [vmem:[#allocation5 + $0x60] sm:$0xff] }
  0x32   :  { %732 = vmatpush3.msra.mxu0 %v95_v5  ;;  %v72_v30 = vld [vmem:[#allocation5 + $0x68] sm:$0xff]  ;;  %v73_v31 = vld [vmem:[#allocation5 + $0x70] sm:$0xff]  ;;  %v74_v32 = vld [vmem:[#allocation5 + $0x78] sm:$0xff] }
  0x33   :  { %733 = vmatprep.subr.mxu0 %v983_v0  ;;  %v75_v33 = vld [vmem:[#allocation5 + $0x80] sm:$0xff]  ;;  %v76_v34 = vld [vmem:[#allocation5 + $0x88] sm:$0xff]  ;;  %v77_v35 = vld [vmem:[#allocation5 + $0x90] sm:$0xff] }
  0x34   :  { %734 = vmatpush3.msra.mxu0 %v94_v6  ;;  %v78_v36 = vld [vmem:[#allocation5 + $0x98] sm:$0xff]  ;;  %v79_v37 = vld [vmem:[#allocation5 + $0xa0] sm:$0xff]  ;;  %v80_v38 = vld [vmem:[#allocation5 + $0xa8] sm:$0xff] }
  0x35   :  { %735 = vmatprep.subr.mxu0 %v983_v0  ;;  %v81_v39 = vld [vmem:[#allocation5 + $0xb0] sm:$0xff]  ;;  %v82_v40 = vld [vmem:[#allocation5 + $0xb8] sm:$0xff]  ;;  %v83_v41 = vld [vmem:[#allocation5 + $0xc0] sm:$0xff] }
  0x36   :  { %736 = vmatpush3.msra.mxu0 %v93_v7  ;;  %v295_v42 = vld [vmem:[#allocation2 + $0x28] sm:$0xff] }
  0x37   :  { %737 = vmatprep.subr.mxu0 %v983_v0  ;;  %659 = vmatprep.mubr.msk.f32.mxu1 %vm347_vm1, %v295_v42  ;;  %v305_v42 = vld [vmem:[#allocation2 + $0x78] sm:$0xff] }
  0x38   :  { %738 = vmatpush3.msra.mxu0 %v92_v8 }
  0x39   :  { %739 = vmatprep.subr.mxu0 %v983_v0 }
  0x3a   :  { %740 = vmatpush3.msra.mxu0 %v91_v9 }
  0x3b   :  { %741 = vmatprep.subr.mxu0 %v983_v0 }
  0x3c   :  { %742 = vmatpush3.msra.mxu0 %v90_v10 }
  0x3d   :  { %743 = vmatprep.subr.mxu0 %v983_v0 }
  0x3e   :  { %744 = vmatpush3.msra.mxu0 %v89_v11 }
  0x3f   :  { %745 = vmatprep.subr.mxu0 %v983_v0 }
  0x40   :  { %746 = vmatpush3.msra.mxu0 %v88_v12 }
  0x41   :  { %747 = vmatprep.subr.mxu0 %v983_v0 }
  0x42   :  { %748 = vmatpush3.msra.mxu0 %v87_v13 }
  0x43   :  { %749 = vmatprep.subr.mxu0 %v983_v0 }
  0x44   :  { %750 = vmatpush3.msra.mxu0 %v86_v14 }
  0x45   :  { %751 = vmatprep.subr.mxu0 %v983_v0 }
  0x46   :  { %752 = vmatpush3.msra.mxu0 %v85_v15 }
  0x47   :  { %753 = vmatprep.subr.mxu0 %v983_v0 }
  0x48   :  { %754 = vmatpush3.msra.mxu0 %v84_v16 }
  0x49   :  { %756 = vmatmul.mubr.f32.vlgmr.msra.gmra.mxu0 %v59_v17  ;;  %423 = vmatprep.subr.mxu0 %v983_v0 }
  0x4a   :  { %758 = vmatprep.mubr.msk.f32.mxu0 %vm984_vm0, %v983_v0 }
  0x4d   :  { %759 = vmatmul.mubr.f32.gmra.mxu0 %v60_v18 }
  0x4e   :  { %761 = vmatprep.mubr.msk.f32.mxu0 %vm984_vm0, %v983_v0 }
  0x51   :  { %762 = vmatmul.mubr.f32.gmra.mxu0 %v61_v19 }
  0x52   :  { %764 = vmatprep.mubr.msk.f32.mxu0 %vm984_vm0, %v983_v0 }
  0x55   :  { %765 = vmatmul.mubr.f32.gmra.mxu0 %v62_v20 }
  0x56   :  { %767 = vmatprep.mubr.msk.f32.mxu0 %vm984_vm0, %v983_v0 }
  0x59   :  { %768 = vmatmul.mubr.f32.gmra.mxu0 %v63_v21 }
  0x5a   :  { %770 = vmatprep.mubr.msk.f32.mxu0 %vm984_vm0, %v983_v0 }
  0x5d   :  { %771 = vmatmul.mubr.f32.gmra.mxu0 %v64_v22 }
  0x5e   :  { %773 = vmatprep.mubr.msk.f32.mxu0 %vm984_vm0, %v983_v0 }
  0x61   :  { %774 = vmatmul.mubr.f32.gmra.mxu0 %v65_v23 }
  0x62   :  { %776 = vmatprep.mubr.msk.f32.mxu0 %vm984_vm0, %v983_v0 }
  0x65   :  { %777 = vmatmul.mubr.f32.gmra.mxu0 %v66_v24 }
  0x66   :  { %779 = vmatprep.mubr.msk.f32.mxu0 %vm984_vm0, %v983_v0 }
  0x69   :  { %780 = vmatmul.mubr.f32.gmra.mxu0 %v67_v25 }
  0x6a   :  { %782 = vmatprep.mubr.msk.f32.mxu0 %vm984_vm0, %v983_v0 }
  0x6d   :  { %783 = vmatmul.mubr.f32.gmra.mxu0 %v68_v26  ;;  %v291_v26 = vld [vmem:[#allocation2 + $0x8] sm:$0xff] }
  0x6e   :  { %785 = vmatprep.mubr.msk.f32.mxu0 %vm984_vm0, %v983_v0 }
  0x71   :  { %786 = vmatmul.mubr.f32.gmra.mxu0 %v69_v27 }
  0x72   :  { %788 = vmatprep.mubr.msk.f32.mxu0 %vm984_vm0, %v983_v0 }
  0x75   :  { %789 = vmatmul.mubr.f32.gmra.mxu0 %v70_v28 }
  0x76   :  { %791 = vmatprep.mubr.msk.f32.mxu0 %vm984_vm0, %v983_v0 }
  0x79   :  { %792 = vmatmul.mubr.f32.gmra.mxu0 %v71_v29 }
  0x7a   :  { %794 = vmatprep.mubr.msk.f32.mxu0 %vm984_vm0, %v983_v0 }
  0x7d   :  { %795 = vmatmul.mubr.f32.gmra.mxu0 %v72_v30 }
  0x7e   :  { %797 = vmatprep.mubr.msk.f32.mxu0 %vm984_vm0, %v983_v0 }
  0x81   :  { %798 = vmatmul.mubr.f32.gmra.mxu0 %v73_v31  ;;  %v294_v31 = vld [vmem:[#allocation2 + $0x20] sm:$0xff] }
  0x82   :  { %800 = vmatprep.mubr.msk.f32.mxu0 %vm984_vm0, %v983_v0 }
  0x85   :  { %801 = vmatmul.mubr.f32.gmra.mxu0 %v74_v32  ;;  %v290_v32 = vld [vmem:[#allocation2] sm:$0xff] }
  0x86   :  { %803 = vmatprep.mubr.msk.f32.mxu0 %vm984_vm0, %v983_v0 }
  0x89   :  { %804 = vmatmul.mubr.f32.gmra.mxu0 %v75_v33  ;;  %v297_v33 = vld [vmem:[#allocation2 + $0x38] sm:$0xff] }
  0x8a   :  { %806 = vmatprep.mubr.msk.f32.mxu0 %vm984_vm0, %v983_v0 }
  0x8d   :  { %807 = vmatmul.mubr.f32.gmra.mxu0 %v76_v34  ;;  %v293_v34 = vld [vmem:[#allocation2 + $0x18] sm:$0xff] }
  0x8e   :  { %809 = vmatprep.mubr.msk.f32.mxu0 %vm984_vm0, %v983_v0 }
  0x91   :  { %810 = vmatmul.mubr.f32.gmra.mxu0 %v77_v35  ;;  %v296_v35 = vld [vmem:[#allocation2 + $0x30] sm:$0xff] }
  0x92   :  { %812 = vmatprep.mubr.msk.f32.mxu0 %vm984_vm0, %v983_v0 }
  0x95   :  { %813 = vmatmul.mubr.f32.gmra.mxu0 %v78_v36  ;;  %v292_v36 = vld [vmem:[#allocation2 + $0x10] sm:$0xff] }
  0x96   :  { %815 = vmatprep.mubr.msk.f32.mxu0 %vm984_vm0, %v983_v0 }
  0x99   :  { %816 = vmatmul.mubr.f32.gmra.mxu0 %v79_v37  ;;  %v299_v37 = vld [vmem:[#allocation2 + $0x48] sm:$0xff] }
  0x9a   :  { %818 = vmatprep.mubr.msk.f32.mxu0 %vm984_vm0, %v983_v0 }
  0x9d   :  { %819 = vmatmul.mubr.f32.gmra.mxu0 %v80_v38  ;;  %v301_v38 = vld [vmem:[#allocation2 + $0x58] sm:$0xff] }
  0x9e   :  { %821 = vmatprep.mubr.msk.f32.mxu0 %vm984_vm0, %v983_v0 }
  0xa1   :  { %822 = vmatmul.mubr.f32.gmra.mxu0 %v81_v39  ;;  %v300_v39 = vld [vmem:[#allocation2 + $0x50] sm:$0xff] }
  0xa2   :  { %824 = vmatprep.mubr.msk.f32.mxu0 %vm984_vm0, %v983_v0 }
  0xa5   :  { %825 = vmatmul.mubr.f32.gmra.mxu0 %v82_v40  ;;  %v303_v40 = vld [vmem:[#allocation2 + $0x68] sm:$0xff] }
  0xa6   :  { %827 = vmatprep.mubr.msk.f32.mxu0 %vm984_vm0, %v983_v0 }
  0xa9   :  { %828 = vmatmul.mubr.f32.gmra.mxu0 %v83_v41  ;;  %v302_v41 = vld [vmem:[#allocation2 + $0x60] sm:$0xff] }
  0xaa   :  { %657 = vmatprep.mubr.msk.f32.mxu0 %vm347_vm1, %v291_v26 }
 0x109   :  { %v1095_v43 = vpop.f32.mrf.mxu0 }
 0x10b   :  { %v757_v44 = vpop.f32.mrf.mxu0 }
 0x10c   :  { %v307_v44 = vld [vmem:[#allocation2 + $0x88] sm:$0xff] }
 0x10d   :  { %v1097_v45 = vpop.f32.mrf.mxu0 }
 0x10f   :  { %v760_v46 = vpop.f32.mrf.mxu0 }
 0x110   :  { %v309_v46 = vld [vmem:[#allocation2 + $0x98] sm:$0xff] }
 0x111   :  { %v1099_v47 = vpop.f32.mrf.mxu0 }
 0x113   :  { %v763_v48 = vpop.f32.mrf.mxu0 }
 0x114   :  { %v311_v48 = vld [vmem:[#allocation2 + $0xa8] sm:$0xff] }
 0x115   :  { %v1101_v49 = vpop.f32.mrf.mxu0 }
 0x117   :  { %v766_v50 = vpop.f32.mrf.mxu0 }
 0x118   :  { %v313_v50 = vld [vmem:[#allocation2 + $0xb8] sm:$0xff] }
 0x119   :  { %v1103_v51 = vpop.f32.mrf.mxu0 }
 0x11b   :  { %v769_v52 = vpop.f32.mrf.mxu0 }
 0x11c   :  { %v315_v52 = vld [vmem:[#allocation2 + $0xc8] sm:$0xff] }
 0x11d   :  { %v1105_v53 = vpop.f32.mrf.mxu0 }
 0x11f   :  { %v772_v54 = vpop.f32.mrf.mxu0 }
 0x120   :  { %v317_v54 = vld [vmem:[#allocation2 + $0xd8] sm:$0xff] }
 0x121   :  { %v1107_v55 = vpop.f32.mrf.mxu0 }
 0x123   :  { %v775_v56 = vpop.f32.mrf.mxu0 }
 0x124   :  { %v319_v56 = vld [vmem:[#allocation2 + $0xe8] sm:$0xff] }
 0x125   :  { %v201_v57 = vpop.f32.mrf.mxu0 }
 0x127   :  { %v778_v58 = vpop.f32.mrf.mxu0 }
 0x128   :  { %v321_v58 = vld [vmem:[#allocation2 + $0xf8] sm:$0xff] }
 0x129   :  { %v206_v59 = vpop.f32.mrf.mxu0 }
 0x12b   :  { %v781_v60 = vpop.f32.mrf.mxu0 }
 0x12c   :  { %v323_v60 = vld [vmem:[#allocation2 + $0x108] sm:$0xff] }
 0x12d   :  { %v211_v61 = vpop.f32.mrf.mxu0 }
 0x12f   :  { %v784_v62 = vpop.f32.mrf.mxu0 }
 0x130   :  { %v325_v62 = vld [vmem:[#allocation2 + $0x118] sm:$0xff] }
 0x131   :  { %v216_v63 = vpop.f32.mrf.mxu0 }
 0x133   :  { %v787_v1 = vpop.f32.mrf.mxu0 }
 0x134   :  { %v327_v1 = vld [vmem:[#allocation2 + $0x128] sm:$0xff] }
 0x135   :  { %v221_v2 = vpop.f32.mrf.mxu0 }
 0x137   :  { %v790_v3 = vpop.f32.mrf.mxu0 }
 0x138   :  { %v329_v3 = vld [vmem:[#allocation2 + $0x138] sm:$0xff] }
 0x139   :  { %v226_v4 = vpop.f32.mrf.mxu0 }
 0x13b   :  { %v793_v5 = vpop.f32.mrf.mxu0 }
 0x13c   :  { %v331_v5 = vld [vmem:[#allocation2 + $0x148] sm:$0xff] }
 0x13d   :  { %v231_v6 = vpop.f32.mrf.mxu0 }
 0x13f   :  { %v796_v7 = vpop.f32.mrf.mxu0 }
 0x140   :  { %v333_v7 = vld [vmem:[#allocation2 + $0x158] sm:$0xff] }
 0x141   :  { %v236_v8 = vpop.f32.mrf.mxu0 }
 0x143   :  { %v799_v9 = vpop.f32.mrf.mxu0 }
 0x144   :  { %v335_v9 = vld [vmem:[#allocation2 + $0x168] sm:$0xff] }
 0x145   :  { %v241_v10 = vpop.f32.mrf.mxu0 }
 0x146   :  { %424 = vmatpush1.msra.mxu0 %v241_v10  ;;  %855 = vmatpush1.msra.mxu1 %v241_v10  ;;  %v334_v10 = vld [vmem:[#allocation2 + $0x160] sm:$0xff] }
 0x147   :  { %v802_v11 = vpop.f32.mrf.mxu0  ;;  %425 = vmatprep.subr.mxu0 %v983_v0  ;;  %831 = vmatprep.subr.mxu1 %v983_v0 }
 0x148   :  { %426 = vmatpush1.msra.mxu0 %v236_v8  ;;  %856 = vmatpush1.msra.mxu1 %v236_v8  ;;  %v332_v8 = vld [vmem:[#allocation2 + $0x150] sm:$0xff]  ;;  %v337_v11 = vld [vmem:[#allocation2 + $0x178] sm:$0xff] }
 0x149   :  { %v1111_v12 = vpop.f32.mrf.mxu0  ;;  %427 = vmatprep.subr.mxu0 %v983_v0  ;;  %832 = vmatprep.subr.mxu1 %v983_v0 }
 0x14a   :  { %428 = vmatpush1.msra.mxu0 %v231_v6  ;;  %857 = vmatpush1.msra.mxu1 %v231_v6  ;;  %v330_v6 = vld [vmem:[#allocation2 + $0x140] sm:$0xff] }
 0x14b   :  { %v805_v13 = vpop.f32.mrf.mxu0  ;;  %429 = vmatprep.subr.mxu0 %v983_v0  ;;  %833 = vmatprep.subr.mxu1 %v983_v0 }
 0x14c   :  { %430 = vmatpush1.msra.mxu0 %v226_v4  ;;  %858 = vmatpush1.msra.mxu1 %v226_v4  ;;  %v328_v4 = vld [vmem:[#allocation2 + $0x130] sm:$0xff]  ;;  %v339_v13 = vld [vmem:[#allocation2 + $0x188] sm:$0xff] }
 0x14d   :  { %v1117_v14 = vpop.f32.mrf.mxu0  ;;  %431 = vmatprep.subr.mxu0 %v983_v0  ;;  %834 = vmatprep.subr.mxu1 %v983_v0 }
 0x14e   :  { %432 = vmatpush1.msra.mxu0 %v221_v2  ;;  %859 = vmatpush1.msra.mxu1 %v221_v2  ;;  %v326_v2 = vld [vmem:[#allocation2 + $0x120] sm:$0xff] }
 0x14f   :  { %v808_v15 = vpop.f32.mrf.mxu0  ;;  %433 = vmatprep.subr.mxu0 %v983_v0  ;;  %835 = vmatprep.subr.mxu1 %v983_v0 }
 0x150   :  { %434 = vmatpush1.msra.mxu0 %v216_v63  ;;  %860 = vmatpush1.msra.mxu1 %v216_v63  ;;  %v324_v63 = vld [vmem:[#allocation2 + $0x110] sm:$0xff]  ;;  %v1214_v15 = vld [vmem:[%s1250_s3] ss:$0 sm:$0xff]  ;;  %s985_s3 = smov [#allocation8]  }
 0x151   :  { %v1123_v16 = vpop.f32.mrf.mxu0  ;;  %435 = vmatprep.subr.mxu0 %v983_v0  ;;  %836 = vmatprep.subr.mxu1 %v983_v0  ;;  %s643_s7 = sshll.u32 %s985_s3, 4  ;;  %s644_s7 = int_to_ptr.vmem [resolvable:$true] %s643_s7 }
 0x152   :  { %436 = vmatpush1.msra.mxu0 %v211_v61  ;;  %861 = vmatpush1.msra.mxu1 %v211_v61  ;;  %v322_v61 = vld [vmem:[#allocation2 + $0x100] sm:$0xff]  ;;  %s950_s8 = scalar_lea.vmem %s644_s7, 3200  ;;  %p955_p2 = scmp.lt.s32.totalorder %s644_s7, %s644_s7 }
 0x153   :  { %v811_v17 = vpop.f32.mrf.mxu0  ;;  %437 = vmatprep.subr.mxu0 %v983_v0  ;;  %837 = vmatprep.subr.mxu1 %v983_v0  ;;  %p951_p1 = scmp.ne.s32.totalorder %s644_s7, %s950_s8  ;;  %p956_p3 = scmp.lt.s32.totalorder %s950_s8, %s950_s8 }
 0x154   :  { %438 = vmatpush1.msra.mxu0 %v206_v59  ;;  %862 = vmatpush1.msra.mxu1 %v206_v59  ;;  %v320_v59 = vld [vmem:[#allocation2 + $0xf0] sm:$0xff] }
 0x155   :  { %v1129_v18 = vpop.f32.mrf.mxu0  ;;  %439 = vmatprep.subr.mxu0 %v983_v0  ;;  %838 = vmatprep.subr.mxu1 %v983_v0  ;;  %p957_p4 = por %p956_p3, %p955_p2 }
 0x156   :  { %440 = vmatpush1.msra.mxu0 %v201_v57  ;;  %863 = vmatpush1.msra.mxu1 %v201_v57  ;;  %v318_v57 = vld [vmem:[#allocation2 + $0xe0] sm:$0xff] }
 0x157   :  { %v814_v19 = vpop.f32.mrf.mxu0  ;;  %441 = vmatprep.subr.mxu0 %v983_v0  ;;  %839 = vmatprep.subr.mxu1 %v983_v0  ;;  %p958_p5 = pnand %p957_p4, %p951_p1 }
 0x158   :  { %442 = vmatpush1.msra.mxu0 %v1107_v55  ;;  %864 = vmatpush1.msra.mxu1 %v1107_v55  ;;  %v316_v55 = vld [vmem:[#allocation2 + $0xd0] sm:$0xff] }
 0x159   :  { %v266_v20 = vpop.f32.mrf.mxu0  ;;  %443 = vmatprep.subr.mxu0 %v983_v0  ;;  %840 = vmatprep.subr.mxu1 %v983_v0 }
 0x15a   :  { %444 = vmatpush1.msra.mxu0 %v1105_v53  ;;  %865 = vmatpush1.msra.mxu1 %v1105_v53  ;;  %v314_v53 = vld [vmem:[#allocation2 + $0xc0] sm:$0xff] }
 0x15b   :  { %v817_v21 = vpop.f32.mrf.mxu0  ;;  %445 = vmatprep.subr.mxu0 %v983_v0  ;;  %841 = vmatprep.subr.mxu1 %v983_v0 }
 0x15c   :  { %446 = vmatpush1.msra.mxu0 %v1103_v51  ;;  %866 = vmatpush1.msra.mxu1 %v1103_v51  ;;  %v312_v51 = vld [vmem:[#allocation2 + $0xb0] sm:$0xff] }
 0x15d   :  { %v271_v22 = vpop.f32.mrf.mxu0  ;;  %447 = vmatprep.subr.mxu0 %v983_v0  ;;  %842 = vmatprep.subr.mxu1 %v983_v0 }
 0x15e   :  { %448 = vmatpush1.msra.mxu0 %v1101_v49  ;;  %867 = vmatpush1.msra.mxu1 %v1101_v49  ;;  %v310_v49 = vld [vmem:[#allocation2 + $0xa0] sm:$0xff] }
 0x15f   :  { %v820_v23 = vpop.f32.mrf.mxu0  ;;  %449 = vmatprep.subr.mxu0 %v983_v0  ;;  %843 = vmatprep.subr.mxu1 %v983_v0 }
 0x160   :  { %450 = vmatpush1.msra.mxu0 %v1099_v47  ;;  %868 = vmatpush1.msra.mxu1 %v1099_v47  ;;  %v308_v47 = vld [vmem:[#allocation2 + $0x90] sm:$0xff] }
 0x161   :  { %v276_v24 = vpop.f32.mrf.mxu0  ;;  %451 = vmatprep.subr.mxu0 %v983_v0  ;;  %844 = vmatprep.subr.mxu1 %v983_v0 }
 0x162   :  { %452 = vmatpush1.msra.mxu0 %v1097_v45  ;;  %869 = vmatpush1.msra.mxu1 %v1097_v45  ;;  %v306_v45 = vld [vmem:[#allocation2 + $0x80] sm:$0xff] }
 0x163   :  { %v823_v25 = vpop.f32.mrf.mxu0  ;;  %453 = vmatprep.subr.mxu0 %v983_v0  ;;  %845 = vmatprep.subr.mxu1 %v983_v0 }
 0x164   :  { %454 = vmatpush1.msra.mxu0 %v1095_v43  ;;  %870 = vmatpush1.msra.mxu1 %v1095_v43  ;;  %v304_v43 = vld [vmem:[#allocation2 + $0x70] sm:$0xff] }
 0x165   :  { %v281_v27 = vpop.f32.mrf.mxu0  ;;  %469 = vmatprep.subr.mxu0 %v983_v0  ;;  %846 = vmatprep.subr.mxu1 %v983_v0 }
 0x167   :  { %v826_v28 = vpop.f32.mrf.mxu0 }
 0x169   :  { %v286_v29 = vpop.f32.mrf.mxu0 }
 0x16a   :  { %470 = vmatpush2.msra.mxu0 %v286_v29  ;;  %871 = vmatpush2.msra.mxu1 %v286_v29 }
 0x16b   :  { %v829_v30 = vpop.f32.mrf.mxu0  ;;  %471 = vmatprep.subr.mxu0 %v983_v0  ;;  %847 = vmatprep.subr.mxu1 %v983_v0 }
 0x16c   :  { %472 = vmatpush2.msra.mxu0 %v281_v27  ;;  %872 = vmatpush2.msra.mxu1 %v281_v27 }
 0x16d   :  { %473 = vmatprep.subr.mxu0 %v983_v0  ;;  %848 = vmatprep.subr.mxu1 %v983_v0 }
 0x16e   :  { %474 = vmatpush2.msra.mxu0 %v276_v24  ;;  %873 = vmatpush2.msra.mxu1 %v276_v24 }
 0x16f   :  { %475 = vmatprep.subr.mxu0 %v983_v0  ;;  %849 = vmatprep.subr.mxu1 %v983_v0 }
 0x170   :  { %476 = vmatpush2.msra.mxu0 %v271_v22  ;;  %874 = vmatpush2.msra.mxu1 %v271_v22 }
 0x171   :  { %477 = vmatprep.subr.mxu0 %v983_v0  ;;  %850 = vmatprep.subr.mxu1 %v983_v0 }
 0x172   :  { %478 = vmatpush2.msra.mxu0 %v266_v20  ;;  %875 = vmatpush2.msra.mxu1 %v266_v20 }
 0x173   :  { %479 = vmatprep.subr.mxu0 %v983_v0  ;;  %851 = vmatprep.subr.mxu1 %v983_v0 }
 0x174   :  { %480 = vmatpush2.msra.mxu0 %v1129_v18  ;;  %876 = vmatpush2.msra.mxu1 %v1129_v18 }
 0x175   :  { %481 = vmatprep.subr.mxu0 %v983_v0  ;;  %852 = vmatprep.subr.mxu1 %v983_v0 }
 0x176   :  { %482 = vmatpush2.msra.mxu0 %v1123_v16  ;;  %877 = vmatpush2.msra.mxu1 %v1123_v16 }
 0x177   :  { %483 = vmatprep.subr.mxu0 %v983_v0  ;;  %853 = vmatprep.subr.mxu1 %v983_v0 }
 0x178   :  { %484 = vmatpush2.msra.mxu0 %v1117_v14  ;;  %878 = vmatpush2.msra.mxu1 %v1117_v14  ;;  %v338_v14 = vld [vmem:[#allocation2 + $0x180] sm:$0xff] }
 0x179   :  { %485 = vmatprep.subr.mxu0 %v983_v0  ;;  %854 = vmatprep.subr.mxu1 %v983_v0  ;;  %v298_v0 = vld [vmem:[#allocation2 + $0x40] sm:$0xff] }
 0x17a   :  { %486 = vmatpush2.msra.mxu0 %v1111_v12  ;;  %879 = vmatpush2.msra.mxu1 %v1111_v12  ;;  %v336_v12 = vld [vmem:[#allocation2 + $0x170] sm:$0xff] }
 0x17b   :  { %498 = vmatmul.mubr.f32.vlgmr.msra.gmra.mxu1 %v294_v31  ;;  %488 = vmatmul.mubr.f32.vlgmr.msra.gmra.mxu0 %v290_v32 }
 0x17c   :  { %660 = vmatprep.mubr.msk.f32.mxu1 %vm347_vm1, %v297_v33  ;;  %658 = vmatprep.mubr.msk.f32.mxu0 %vm347_vm1, %v293_v34 }
 0x17f   :  { %503 = vmatmul.mubr.f32.gmra.mxu1 %v296_v35  ;;  %493 = vmatmul.mubr.f32.gmra.mxu0 %v292_v36 }
 0x180   :  { %661 = vmatprep.mubr.msk.f32.mxu1 %vm347_vm1, %v299_v37 }
 0x183   :  { %508 = vmatmul.mubr.f32.gmra.mxu1 %v298_v0 }
 0x184   :  { %662 = vmatprep.mubr.msk.f32.mxu1 %vm347_vm1, %v301_v38 }
 0x187   :  { %513 = vmatmul.mubr.f32.gmra.mxu1 %v300_v39 }
 0x188   :  { %663 = vmatprep.mubr.msk.f32.mxu1 %vm347_vm1, %v303_v40 }
 0x18b   :  { %518 = vmatmul.mubr.f32.gmra.mxu1 %v302_v41 }
 0x18c   :  { %664 = vmatprep.mubr.msk.f32.mxu1 %vm347_vm1, %v305_v42 }
 0x18f   :  { %523 = vmatmul.mubr.f32.gmra.mxu1 %v304_v43 }
 0x190   :  { %665 = vmatprep.mubr.msk.f32.mxu1 %vm347_vm1, %v307_v44 }
 0x193   :  { %528 = vmatmul.mubr.f32.gmra.mxu1 %v306_v45 }
 0x194   :  { %666 = vmatprep.mubr.msk.f32.mxu1 %vm347_vm1, %v309_v46 }
 0x197   :  { %533 = vmatmul.mubr.f32.gmra.mxu1 %v308_v47 }
 0x198   :  { %667 = vmatprep.mubr.msk.f32.mxu1 %vm347_vm1, %v311_v48 }
 0x19b   :  { %538 = vmatmul.mubr.f32.gmra.mxu1 %v310_v49 }
 0x19c   :  { %668 = vmatprep.mubr.msk.f32.mxu1 %vm347_vm1, %v313_v50 }
 0x19f   :  { %543 = vmatmul.mubr.f32.gmra.mxu1 %v312_v51 }
 0x1a0   :  { %669 = vmatprep.mubr.msk.f32.mxu1 %vm347_vm1, %v315_v52 }
 0x1a3   :  { %548 = vmatmul.mubr.f32.gmra.mxu1 %v314_v53 }
 0x1a4   :  { %670 = vmatprep.mubr.msk.f32.mxu1 %vm347_vm1, %v317_v54 }
 0x1a7   :  { %553 = vmatmul.mubr.f32.gmra.mxu1 %v316_v55 }
 0x1a8   :  { %671 = vmatprep.mubr.msk.f32.mxu1 %vm347_vm1, %v319_v56 }
 0x1ab   :  { %558 = vmatmul.mubr.f32.gmra.mxu1 %v318_v57 }
 0x1ac   :  { %672 = vmatprep.mubr.msk.f32.mxu1 %vm347_vm1, %v321_v58 }
 0x1af   :  { %563 = vmatmul.mubr.f32.gmra.mxu1 %v320_v59 }
 0x1b0   :  { %673 = vmatprep.mubr.msk.f32.mxu1 %vm347_vm1, %v323_v60 }
 0x1b3   :  { %568 = vmatmul.mubr.f32.gmra.mxu1 %v322_v61 }
 0x1b4   :  { %674 = vmatprep.mubr.msk.f32.mxu1 %vm347_vm1, %v325_v62 }
 0x1b7   :  { %573 = vmatmul.mubr.f32.gmra.mxu1 %v324_v63 }
 0x1b8   :  { %675 = vmatprep.mubr.msk.f32.mxu1 %vm347_vm1, %v327_v1 }
 0x1bb   :  { %578 = vmatmul.mubr.f32.gmra.mxu1 %v326_v2 }
 0x1bc   :  { %676 = vmatprep.mubr.msk.f32.mxu1 %vm347_vm1, %v329_v3 }
 0x1bf   :  { %583 = vmatmul.mubr.f32.gmra.mxu1 %v328_v4 }
 0x1c0   :  { %677 = vmatprep.mubr.msk.f32.mxu1 %vm347_vm1, %v331_v5 }
 0x1c3   :  { %588 = vmatmul.mubr.f32.gmra.mxu1 %v330_v6 }
 0x1c4   :  { %678 = vmatprep.mubr.msk.f32.mxu1 %vm347_vm1, %v333_v7 }
 0x1c7   :  { %593 = vmatmul.mubr.f32.gmra.mxu1 %v332_v8 }
 0x1c8   :  { %679 = vmatprep.mubr.msk.f32.mxu1 %vm347_vm1, %v335_v9 }
 0x1cb   :  { %598 = vmatmul.mubr.f32.gmra.mxu1 %v334_v10 }
 0x1cc   :  { %680 = vmatprep.mubr.msk.f32.mxu1 %vm347_vm1, %v337_v11 }
 0x1cf   :  { %603 = vmatmul.mubr.f32.gmra.mxu1 %v336_v12 }
 0x1d0   :  { %681 = vmatprep.mubr.msk.f32.mxu1 %vm347_vm1, %v339_v13 }
 0x1d3   :  { %608 = vmatmul.mubr.f32.gmra.mxu1 %v338_v14 }
 0x23b   :  { %v499_v16 = vpop.f32.mrf.mxu1  ;;  %v489_v17 = vpop.f32.mrf.mxu0 }
 0x23c   :  { %v500_v18 = vadd.f32 %v1214_v15, %v499_v16  ;;  %v490_v19 = vadd.f32 %v1214_v15, %v489_v17 }
 0x23d   :  { %v501_v20 = vpop.f32.mrf.mxu1  ;;  %v491_v21 = vpop.f32.mrf.mxu0 }
 0x23e   :  { %615 = vst [vmem:[#allocation8 + $0x10] sm:$0xff] %v500_v18  ;;  %613 = vst [vmem:[#allocation8] sm:$0xff] %v490_v19 }
 0x23f   :  { %v504_v22 = vpop.f32.mrf.mxu1  ;;  %v494_v23 = vpop.f32.mrf.mxu0 }
 0x240   :  { %v505_v24 = vadd.f32 %v1214_v15, %v504_v22  ;;  %v495_v25 = vadd.f32 %v1214_v15, %v494_v23 }
 0x241   :  { %v506_v26 = vpop.f32.mrf.mxu1  ;;  %v496_v27 = vpop.f32.mrf.mxu0 }
 0x242   :  { %616 = vst [vmem:[#allocation8 + $0x18] sm:$0xff] %v505_v24  ;;  %614 = vst [vmem:[#allocation8 + $0x8] sm:$0xff] %v495_v25 }
 0x243   :  { %v509_v28 = vpop.f32.mrf.mxu1 }
 0x244   :  { %v510_v29 = vadd.f32 %v1214_v15, %v509_v28 }
 0x245   :  { %v511_v30 = vpop.f32.mrf.mxu1 }
 0x246   :  { %617 = vst [vmem:[#allocation8 + $0x20] sm:$0xff] %v510_v29 }
 0x247   :  { %v514_v31 = vpop.f32.mrf.mxu1 }
 0x248   :  { %v515_v32 = vadd.f32 %v1214_v15, %v514_v31 }
 0x249   :  { %v516_v33 = vpop.f32.mrf.mxu1 }
 0x24a   :  { %618 = vst [vmem:[#allocation8 + $0x28] sm:$0xff] %v515_v32 }
 0x24b   :  { %v519_v34 = vpop.f32.mrf.mxu1 }
 0x24c   :  { %v520_v35 = vadd.f32 %v1214_v15, %v519_v34 }
 0x24d   :  { %v521_v36 = vpop.f32.mrf.mxu1 }
 0x24e   :  { %619 = vst [vmem:[#allocation8 + $0x30] sm:$0xff] %v520_v35 }
 0x24f   :  { %v524_v37 = vpop.f32.mrf.mxu1 }
 0x250   :  { %v525_v0 = vadd.f32 %v1214_v15, %v524_v37 }
 0x251   :  { %v526_v38 = vpop.f32.mrf.mxu1 }
 0x252   :  { %620 = vst [vmem:[#allocation8 + $0x38] sm:$0xff] %v525_v0 }
 0x253   :  { %v529_v39 = vpop.f32.mrf.mxu1 }
 0x254   :  { %v530_v40 = vadd.f32 %v1214_v15, %v529_v39 }
 0x255   :  { %v531_v41 = vpop.f32.mrf.mxu1 }
 0x256   :  { %621 = vst [vmem:[#allocation8 + $0x40] sm:$0xff] %v530_v40 }
 0x257   :  { %v534_v42 = vpop.f32.mrf.mxu1 }
 0x258   :  { %v535_v43 = vadd.f32 %v1214_v15, %v534_v42 }
 0x259   :  { %v536_v44 = vpop.f32.mrf.mxu1 }
 0x25a   :  { %622 = vst [vmem:[#allocation8 + $0x48] sm:$0xff] %v535_v43 }
 0x25b   :  { %v539_v45 = vpop.f32.mrf.mxu1 }
 0x25c   :  { %v540_v46 = vadd.f32 %v1214_v15, %v539_v45 }
 0x25d   :  { %v541_v47 = vpop.f32.mrf.mxu1 }
 0x25e   :  { %623 = vst [vmem:[#allocation8 + $0x50] sm:$0xff] %v540_v46 }
 0x25f   :  { %v544_v48 = vpop.f32.mrf.mxu1 }
 0x260   :  { %v545_v49 = vadd.f32 %v1214_v15, %v544_v48 }
 0x261   :  { %v546_v50 = vpop.f32.mrf.mxu1 }
 0x262   :  { %624 = vst [vmem:[#allocation8 + $0x58] sm:$0xff] %v545_v49 }
 0x263   :  { %v549_v51 = vpop.f32.mrf.mxu1 }
 0x264   :  { %v550_v52 = vadd.f32 %v1214_v15, %v549_v51 }
 0x265   :  { %v551_v53 = vpop.f32.mrf.mxu1 }
 0x266   :  { %625 = vst [vmem:[#allocation8 + $0x60] sm:$0xff] %v550_v52 }
 0x267   :  { %v554_v54 = vpop.f32.mrf.mxu1 }
 0x268   :  { %v555_v55 = vadd.f32 %v1214_v15, %v554_v54 }
 0x269   :  { %v556_v56 = vpop.f32.mrf.mxu1 }
 0x26a   :  { %626 = vst [vmem:[#allocation8 + $0x68] sm:$0xff] %v555_v55 }
 0x26b   :  { %v559_v57 = vpop.f32.mrf.mxu1 }
 0x26c   :  { %v560_v58 = vadd.f32 %v1214_v15, %v559_v57 }
 0x26d   :  { %v561_v59 = vpop.f32.mrf.mxu1 }
 0x26e   :  { %627 = vst [vmem:[#allocation8 + $0x70] sm:$0xff] %v560_v58 }
 0x26f   :  { %v564_v60 = vpop.f32.mrf.mxu1 }
 0x270   :  { %v565_v61 = vadd.f32 %v1214_v15, %v564_v60 }
 0x271   :  { %v566_v62 = vpop.f32.mrf.mxu1 }
 0x272   :  { %628 = vst [vmem:[#allocation8 + $0x78] sm:$0xff] %v565_v61 }
 0x273   :  { %v569_v63 = vpop.f32.mrf.mxu1 }
 0x274   :  { %v570_v1 = vadd.f32 %v1214_v15, %v569_v63 }
 0x275   :  { %v571_v2 = vpop.f32.mrf.mxu1 }
 0x276   :  { %629 = vst [vmem:[#allocation8 + $0x80] sm:$0xff] %v570_v1 }
 0x277   :  { %v574_v3 = vpop.f32.mrf.mxu1 }
 0x278   :  { %v575_v4 = vadd.f32 %v1214_v15, %v574_v3 }
 0x279   :  { %v576_v5 = vpop.f32.mrf.mxu1 }
 0x27a   :  { %630 = vst [vmem:[#allocation8 + $0x88] sm:$0xff] %v575_v4 }
 0x27b   :  { %v579_v6 = vpop.f32.mrf.mxu1 }
 0x27c   :  { %v580_v7 = vadd.f32 %v1214_v15, %v579_v6 }
 0x27d   :  { %v581_v8 = vpop.f32.mrf.mxu1 }
 0x27e   :  { %631 = vst [vmem:[#allocation8 + $0x90] sm:$0xff] %v580_v7 }
 0x27f   :  { %v584_v9 = vpop.f32.mrf.mxu1 }
 0x280   :  { %v585_v10 = vadd.f32 %v1214_v15, %v584_v9 }
 0x281   :  { %v586_v11 = vpop.f32.mrf.mxu1 }
 0x282   :  { %632 = vst [vmem:[#allocation8 + $0x98] sm:$0xff] %v585_v10 }
 0x283   :  { %v589_v12 = vpop.f32.mrf.mxu1 }
 0x284   :  { %v590_v13 = vadd.f32 %v1214_v15, %v589_v12 }
 0x285   :  { %v591_v14 = vpop.f32.mrf.mxu1 }
 0x286   :  { %633 = vst [vmem:[#allocation8 + $0xa0] sm:$0xff] %v590_v13 }
 0x287   :  { %v594_v16 = vpop.f32.mrf.mxu1 }
 0x288   :  { %v595_v17 = vadd.f32 %v1214_v15, %v594_v16 }
 0x289   :  { %v596_v18 = vpop.f32.mrf.mxu1 }
 0x28a   :  { %634 = vst [vmem:[#allocation8 + $0xa8] sm:$0xff] %v595_v17 }
 0x28b   :  { %v599_v19 = vpop.f32.mrf.mxu1 }
 0x28c   :  { %v600_v20 = vadd.f32 %v1214_v15, %v599_v19 }
 0x28d   :  { %v601_v21 = vpop.f32.mrf.mxu1 }
 0x28e   :  { %635 = vst [vmem:[#allocation8 + $0xb0] sm:$0xff] %v600_v20 }
 0x28f   :  { %v604_v22 = vpop.f32.mrf.mxu1 }
 0x290   :  { %v605_v23 = vadd.f32 %v1214_v15, %v604_v22 }
 0x291   :  { %v606_v24 = vpop.f32.mrf.mxu1 }
 0x292   :  { %636 = vst [vmem:[#allocation8 + $0xb8] sm:$0xff] %v605_v23 }
 0x293   :  { %v609_v25 = vpop.f32.mrf.mxu1 }
 0x294   :  { %v610_v26 = vadd.f32 %v1214_v15, %v609_v25 }
 0x295   :  { %v611_v27 = vpop.f32.mrf.mxu1 }
 0x296   :  { %637 = vst [vmem:[#allocation8 + $0xc0] sm:$0xff] %v610_v26 }
 0x297   :  { %961 = shalt.err (!%p958_p5)
}
 0x298   :  { %649 = dma.vmem_to_hbm [thread:$0]  %s644_s7, 3200, %s1251_s4, [#allocation4], %s977_s18, %s977_s18, %s978_s19  }
 0x299   :  { %974 = dma.done.wait [#allocation4], 3200  }
 0x29a   :  { %975 = vsyncadd [#allocation4], 4294964096 }
 0x29b   :  { %653 = vsyncpa [#allocation3], 1 }
 0x29c   :  { %654 = vsyncpa [#allocation6], 1 }
 0x29d   :  { %655 = vsyncpa [#allocation4], 1 }

</bundles_post_ra>
